<compile_context>
chip_gen: v7x
topology: tpu7x:2x2x1
jax: 0.10.0
libtpu: 0.0.40
codegen_flags: <defaults>
</compile_context>

<pallas_src>
import functools

import jax
import jax.numpy as jnp
from jax.experimental import pallas as pl
from jax.experimental.pallas import tpu as pltpu


# --------------------------------------------------------------------------- #
# Kernels
# --------------------------------------------------------------------------- #
def _layernorm2d_resident_kernel(n, valid_l, x_ref, scale_ref, offset_ref, o_ref):
    """Whole-sample-resident path.

    x_ref/o_ref: (B, R, L) ; scale_ref/offset_ref: (R, 1)
    n = real element count per sample (C*H*W); valid_l = real lane count (<= L).
    """
    _, _, L = x_ref.shape

    # Pass 1: mean.  Zero lane-padding (if any) does not perturb the sum.
    # Staged reduce: sublanes (VPU) first, then one cross-lane (XLU) per sample.
    x = x_ref[...].astype(jnp.float32)
    s = jnp.sum(jnp.sum(x, axis=1, keepdims=True), axis=2, keepdims=True)  # (B,1,1)
    mean = s * (1.0 / n)

    # Pass 2: unbiased variance (Bessel, ddof=1) — two-pass, no cancellation.
    # Re-read from the ref so the whole block need not stay live in vregs.
    d = x_ref[...].astype(jnp.float32) - mean
    if valid_l != L:
        lane = jax.lax.broadcasted_iota(jnp.int32, (1, 1, L), 2)
        d = jnp.where(lane < valid_l, d, 0.0)
    ss = jnp.sum(jnp.sum(d * d, axis=1, keepdims=True), axis=2, keepdims=True)
    inv_std = jax.lax.rsqrt(ss * (1.0 / (n - 1)))                 # EUP slot
    # NOTE: no eps (faithful to the torch module); constant sample -> inf/NaN.

    # Fold normalize + affine into one multiply-add per element.
    a = scale_ref[...] * inv_std                                  # (B, R, 1)
    b = offset_ref[...] - mean * a                                # (B, R, 1)
    o_ref[...] = (x_ref[...] * a + b).astype(o_ref.dtype)


def _stats_kernel(n, x_ref, mean_ref, istd_ref):
    """L-tiled stats: accumulate sum / sumsq across lane tiles, finalize on last.

    x_ref: (1, R, Lt) ; mean_ref/istd_ref: (1, 1, 1) accumulators (revisited).
    """
    li = pl.program_id(1)

    @pl.when(li == 0)
    def _():
        mean_ref[...] = jnp.zeros_like(mean_ref)
        istd_ref[...] = jnp.zeros_like(istd_ref)

    x = x_ref[...].astype(jnp.float32)
    mean_ref[...] += jnp.sum(jnp.sum(x, axis=1, keepdims=True), axis=2, keepdims=True)
    istd_ref[...] += jnp.sum(jnp.sum(x * x, axis=1, keepdims=True), axis=2, keepdims=True)

    @pl.when(li == pl.num_programs(1) - 1)
    def _():
        s = mean_ref[...]
        ss = istd_ref[...]
        mean = s * (1.0 / n)
        # One-pass variance across tiles; clamp guards f32 cancellation so rsqrt
        # never sees a (slightly) negative value.
        var = jnp.maximum((ss - s * mean) * (1.0 / (n - 1)), 0.0)
        mean_ref[...] = mean
        istd_ref[...] = jax.lax.rsqrt(var)


def _normalize_kernel(x_ref, mean_ref, istd_ref, scale_ref, offset_ref, o_ref):
    """L-tiled normalize: per-sample mean/istd already computed."""
    a = scale_ref[...] * istd_ref[...]            # (R,1)*(1,1,1) -> (1,R,1)
    b = offset_ref[...] - mean_ref[...] * a
    o_ref[...] = (x_ref[...] * a + b).astype(o_ref.dtype)


# --------------------------------------------------------------------------- #
# Policy helpers
# --------------------------------------------------------------------------- #
_VMEM_BLOCK_BUDGET = 16 * 1024 * 1024   # bytes for pipelined blocks (~4x block resident)
_TILE_TARGET_BYTES = 2 * 1024 * 1024    # target lane-tile size for the L-tiled path


def _vmem_capacity_bytes():
    try:
        cap = int(pltpu.get_tpu_info().vmem_capacity_bytes)
        if cap > 0:
            return cap
    except Exception:
        pass
    return 64 * 1024 * 1024  # conservative default (v7x per-TC VMEM)


def _num_tensorcores():
    try:
        info = pltpu.get_tpu_info()
        for attr in ("num_tensorcores", "tensorcores_per_chip", "num_cores",
                     "cores_per_chip"):
            v = getattr(info, attr, None)
            if v:
                return max(1, int(v))
    except Exception:
        pass
    try:
        return max(1, int(getattr(jax.devices()[0], "num_cores", 1)))
    except Exception:
        return 1


def _pick_layout(C, HW):
    """Per-sample slab (R, L) = (C*r, HW//r): L lane-dense, sublanes filled.
    Only called when HW % 128 == 0."""
    q = HW // 128
    divisors = [r for r in range(1, q + 1) if q % r == 0]
    for r in divisors:
        if C * r >= 8:               # fill the 8 sublanes of a vreg
            return C * r, HW // r, r
    r = divisors[-1]
    return C * r, HW // r, r


def _pick_batch_tile(N, sample_bytes, num_cores, block_budget):
    """Samples per grid step, sized by bytes only (in+out, double-buffered -> 4x).
    The multi-step requirement is applied only on multi-TensorCore chips."""
    max_b = max(1, block_budget // (4 * sample_bytes))
    if num_cores > 1 and N >= 2:
        max_b = min(max_b, max(1, N // num_cores))
    return max(1, min(max_b, N))


def _in_block_spec(shape, index_map, multi_buffer):
    if multi_buffer:
        try:
            return pl.BlockSpec(shape, index_map, pipeline_mode=pl.Buffered(3))
        except Exception:
            pass
    return pl.BlockSpec(shape, index_map)


# --------------------------------------------------------------------------- #
# pallas_call wrappers
# --------------------------------------------------------------------------- #
def _resident_call(x2, s_rows, b_rows, n, valid_l, num_cores, vmem_cap,
                   resident_budget, block_samples=None):
    N, R, L = x2.shape
    itemsize = x2.dtype.itemsize
    sample_bytes = R * L * itemsize

    if block_samples is not None:
        b_tile = max(1, min(int(block_samples), N))
    else:
        block_budget = min(_VMEM_BLOCK_BUDGET, resident_budget)
        b_tile = _pick_batch_tile(N, sample_bytes, num_cores, block_budget)

    block_bytes = b_tile * sample_bytes
    num_steps = pl.cdiv(N, b_tile)           # ragged last block is fine (see kernel)
    vmem_limit = int(min(max(vmem_cap - (4 << 20), 16 << 20),
                         max(32 << 20, 4 * block_bytes + (4 << 20))))

    # Tiny blocks + enough steps: deepen the pipeline so DMA latency stays hidden.
    multi_buffer = (block_bytes < (1 << 20)) and (num_steps >= 3)

    cost = pl.CostEstimate(
        flops=7 * N * R * L,
        transcendentals=N,
        bytes_accessed=2 * N * R * L * itemsize,
    )

    return pl.pallas_call(
        functools.partial(_layernorm2d_resident_kernel, n, valid_l),
        out_shape=jax.ShapeDtypeStruct((N, R, L), x2.dtype),
        grid_spec=pltpu.PrefetchScalarGridSpec(
            num_scalar_prefetch=0,
            grid=(num_steps,),
            in_specs=[
                _in_block_spec((b_tile, R, L), lambda i: (i, 0, 0), multi_buffer),
                pl.BlockSpec((R, 1), lambda i: (0, 0)),
                pl.BlockSpec((R, 1), lambda i: (0, 0)),
            ],
            out_specs=pl.BlockSpec((b_tile, R, L), lambda i: (i, 0, 0)),
        ),
        compiler_params=pltpu.CompilerParams(
            dimension_semantics=("parallel",),
            vmem_limit_bytes=vmem_limit,
        ),
        cost_estimate=cost,
    )(x2, s_rows, b_rows)


def _tiled_call(x2, s_rows, b_rows, n, vmem_cap):
    """Samples too big for whole-sample VMEM residency: accumulate stats over
    lane tiles, then stream a normalize pass (one extra HBM read of x)."""
    N, R, L = x2.shape
    itemsize = x2.dtype.itemsize

    # Lane tile: a multiple-of-128 divisor of L targeting ~2 MiB blocks
    # (must divide L exactly — the L axis is a reduction axis in the stats pass).
    q = L // 128
    target_q = max(1, _TILE_TARGET_BYTES // (R * 128 * itemsize))
    best = 1
    for d in range(1, q + 1):
        if q % d == 0 and d <= target_q:
            best = d
    lt = best * 128
    nL = L // lt

    block_bytes = R * lt * itemsize
    vmem_limit = int(min(max(vmem_cap - (4 << 20), 16 << 20),
                         max(32 << 20, 8 * block_bytes + (8 << 20))))

    mean, istd = pl.pallas_call(
        functools.partial(_stats_kernel, n),
        out_shape=(jax.ShapeDtypeStruct((N, 1, 1), jnp.float32),
                   jax.ShapeDtypeStruct((N, 1, 1), jnp.float32)),
        grid_spec=pltpu.PrefetchScalarGridSpec(
            num_scalar_prefetch=0,
            grid=(N, nL),
            in_specs=[pl.BlockSpec((1, R, lt), lambda b, l: (b, 0, l))],
            out_specs=(pl.BlockSpec((1, 1, 1), lambda b, l: (b, 0, 0)),
                       pl.BlockSpec((1, 1, 1), lambda b, l: (b, 0, 0))),
        ),
        compiler_params=pltpu.CompilerParams(
            dimension_semantics=("parallel", "arbitrary"),
            vmem_limit_bytes=vmem_limit,
        ),
    )(x2)

    out = pl.pallas_call(
        _normalize_kernel,
        out_shape=jax.ShapeDtypeStruct((N, R, L), x2.dtype),
        grid_spec=pltpu.PrefetchScalarGridSpec(
            num_scalar_prefetch=0,
            grid=(N, nL),
            in_specs=[
                pl.BlockSpec((1, R, lt), lambda b, l: (b, 0, l)),
                pl.BlockSpec((1, 1, 1), lambda b, l: (b, 0, 0)),
                pl.BlockSpec((1, 1, 1), lambda b, l: (b, 0, 0)),
                pl.BlockSpec((R, 1), lambda b, l: (0, 0)),
                pl.BlockSpec((R, 1), lambda b, l: (0, 0)),
            ],
            out_specs=pl.BlockSpec((1, R, lt), lambda b, l: (b, 0, l)),
        ),
        compiler_params=pltpu.CompilerParams(
            dimension_semantics=("parallel", "arbitrary"),
            vmem_limit_bytes=vmem_limit,
        ),
    )(x2, mean, istd, s_rows, b_rows)
    return out


def my_layer_norm_2d(x, scale, offset, *, force_tiled=False, block_samples=None):
    """x: (N, C, H, W); scale/offset: (1, C, 1, 1) -> (N, C, H, W)."""
    N, C, H, W = x.shape
    HW = H * W
    n = C * HW

    if HW % 128 == 0:
        R, L, r = _pick_layout(C, HW)
        x2 = x.reshape(N, R, L)
        valid_l = L
    else:
        # Lane-dense fallback: zero-pad the lane axis to a multiple of 128 so
        # stores stay unmasked; the variance pass masks the tail lanes.
        r = 1
        R = C
        L = ((HW + 127) // 128) * 128
        x2 = jnp.pad(x.reshape(N, C, HW), ((0, 0), (0, 0), (0, L - HW)))
        valid_l = HW

    s_rows = jnp.repeat(scale.reshape(C), r).reshape(R, 1).astype(x.dtype)
    b_rows = jnp.repeat(offset.reshape(C), r).reshape(R, 1).astype(x.dtype)

    vmem_cap = _vmem_capacity_bytes()
    num_cores = _num_tensorcores()
    sample_bytes = R * L * x2.dtype.itemsize
    resident_budget = max(vmem_cap - (16 << 20), 16 << 20)
    use_tiled = force_tiled or (4 * sample_bytes > resident_budget)

    if use_tiled:
        out = _tiled_call(x2, s_rows, b_rows, n, vmem_cap)
    else:
        out = _resident_call(x2, s_rows, b_rows, n, valid_l, num_cores, vmem_cap,
                             resident_budget, block_samples=block_samples)

    if valid_l != L:
        out = out[:, :, :HW]
    return out.reshape(N, C, H, W)


# --------------------------------------------------------------------------- #
# Reference + tests
# --------------------------------------------------------------------------- #
def _reference(x, scale, offset):
    mean = jnp.mean(x, axis=(-3, -2, -1), keepdims=True)
    var = jnp.var(x, axis=(-3, -2, -1), keepdims=True, ddof=1)  # unbiased (torch.std)
    return scale * (x - mean) / jnp.sqrt(var) + offset


if __name__ == "__main__":
    key = jax.random.PRNGKey(0)
    kx, ks, kb, kx2, kx3 = jax.random.split(key, 5)

    # Shapes implied by the module: N=2, C=4, spatial 16x16.
    N, C, H, W = 2, 4, 16, 16
    x = jax.random.normal(kx, (N, C, H, W), dtype=jnp.float32)

    # Module-faithful parameter init (ones / zeros).
    scale = jnp.ones((1, C, 1, 1), dtype=jnp.float32)
    offset = jnp.zeros((1, C, 1, 1), dtype=jnp.float32)
    y = my_layer_norm_2d(x, scale, offset)
    jax.block_until_ready(y)
    assert jnp.allclose(y, _reference(x, scale, offset), atol=1e-5, rtol=1e-5), \
        "mismatch (unit params)"

    # Non-trivial per-channel params (exercises row repack + affine fold).
    scale2 = jax.random.normal(ks, (1, C, 1, 1), dtype=jnp.float32)
    offset2 = jax.random.normal(kb, (1, C, 1, 1), dtype=jnp.float32)
    y2 = my_layer_norm_2d(x, scale2, offset2)
    jax.block_until_ready(y2)
    assert jnp.allclose(y2, _reference(x, scale2, offset2), atol=1e-5, rtol=1e-5), \
        "mismatch (random params)"

    # Ragged batch grid (cdiv path, batch tile does not divide N).
    x3 = jax.random.normal(kx2, (3, C, H, W), dtype=jnp.float32) * 2.0 + 1.0
    y3 = my_layer_norm_2d(x3, scale2, offset2, block_samples=2)
    jax.block_until_ready(y3)
    assert jnp.allclose(y3, _reference(x3, scale2, offset2), atol=1e-5, rtol=1e-5), \
        "mismatch (ragged batch grid)"

    # L-tiled large-sample fallback, forced at a small shape for validation.
    y4 = my_layer_norm_2d(x, scale2, offset2, force_tiled=True)
    jax.block_until_ready(y4)
    assert jnp.allclose(y4, _reference(x, scale2, offset2), atol=1e-5, rtol=1e-5), \
        "mismatch (L-tiled path)"

    # HW not a multiple of 128 (lane-padded path with masked variance).
    x5 = jax.random.normal(kx3, (2, C, 10, 10), dtype=jnp.float32)
    y5 = my_layer_norm_2d(x5, scale2, offset2)
    jax.block_until_ready(y5)
    assert jnp.allclose(y5, _reference(x5, scale2, offset2), atol=1e-5, rtol=1e-5), \
        "mismatch (non-aligned HW)"

    print("KERNEL_OK")
</pallas_src>

<mosaic_0001>
module attributes {stable_mosaic.version = 11 : i64} {
  func.func @_layernorm2d_resident_kernel(%arg0: i32, %arg1: memref<2x8x128xf32, #tpu.memory_space<vmem>>, %arg2: memref<8x1xf32, #tpu.memory_space<vmem>>, %arg3: memref<8x1xf32, #tpu.memory_space<vmem>>, %arg4: memref<2x8x128xf32, #tpu.memory_space<vmem>>) attributes {dimension_semantics = [#tpu.dimension_semantics<parallel>], iteration_bounds = array<i64: 1>, scalar_prefetch = 0 : i64, scratch_operands = 0 : i64, tpu.core_type = #tpu.core_type<tc>, window_params = [{transform_indices = @transform_0, window_bounds = array<i64: 2, 8, 128>}, {pipeline_mode = #tpu.pipeline_mode<synchronous>, transform_indices = @transform_1, window_bounds = array<i64: 8, 1>}, {pipeline_mode = #tpu.pipeline_mode<synchronous>, transform_indices = @transform_2, window_bounds = array<i64: 8, 1>}, {transform_indices = @transform_3, window_bounds = array<i64: 2, 8, 128>}]} {
    %c0 = arith.constant 0 : index
    %c0_0 = arith.constant 0 : index
    %c0_1 = arith.constant 0 : index
    %0 = vector.load %arg1[%c0, %c0_0, %c0_1] : memref<2x8x128xf32, #tpu.memory_space<vmem>>, vector<2x8x128xf32>
    %cst = arith.constant dense<0.000000e+00> : vector<2x128xf32>
    %1 = vector.multi_reduction <add>, %0, %cst [1] : vector<2x8x128xf32> to vector<2x128xf32>
    %2 = vector.shape_cast %1 : vector<2x128xf32> to vector<2x1x128xf32>
    %cst_2 = arith.constant dense<0.000000e+00> : vector<2x1xf32>
    %3 = vector.multi_reduction <add>, %2, %cst_2 [2] : vector<2x1x128xf32> to vector<2x1xf32>
    %4 = vector.shape_cast %3 : vector<2x1xf32> to vector<2x1x1xf32>
    %cst_3 = arith.constant 9.765625E-4 : f32
    %5 = vector.broadcast %cst_3 : f32 to vector<2x1x1xf32>
    %6 = arith.mulf %4, %5 : vector<2x1x1xf32>
    %c0_4 = arith.constant 0 : index
    %c0_5 = arith.constant 0 : index
    %c0_6 = arith.constant 0 : index
    %7 = vector.load %arg1[%c0_4, %c0_5, %c0_6] : memref<2x8x128xf32, #tpu.memory_space<vmem>>, vector<2x8x128xf32>
    %8 = vector.broadcast %6 : vector<2x1x1xf32> to vector<2x8x128xf32>
    %9 = arith.subf %7, %8 : vector<2x8x128xf32>
    %10 = arith.mulf %9, %9 : vector<2x8x128xf32>
    %cst_7 = arith.constant dense<0.000000e+00> : vector<2x128xf32>
    %11 = vector.multi_reduction <add>, %10, %cst_7 [1] : vector<2x8x128xf32> to vector<2x128xf32>
    %12 = vector.shape_cast %11 : vector<2x128xf32> to vector<2x1x128xf32>
    %cst_8 = arith.constant dense<0.000000e+00> : vector<2x1xf32>
    %13 = vector.multi_reduction <add>, %12, %cst_8 [2] : vector<2x1x128xf32> to vector<2x1xf32>
    %14 = vector.shape_cast %13 : vector<2x1xf32> to vector<2x1x1xf32>
    %cst_9 = arith.constant 9.77517105E-4 : f32
    %15 = vector.broadcast %cst_9 : f32 to vector<2x1x1xf32>
    %16 = arith.mulf %14, %15 : vector<2x1x1xf32>
    %17 = math.rsqrt %16 : vector<2x1x1xf32>
    %c0_10 = arith.constant 0 : index
    %c0_11 = arith.constant 0 : index
    %18 = vector.load %arg2[%c0_10, %c0_11] : memref<8x1xf32, #tpu.memory_space<vmem>>, vector<8x1xf32>
    %19 = vector.shape_cast %18 : vector<8x1xf32> to vector<1x8x1xf32>
    %20 = vector.broadcast %19 : vector<1x8x1xf32> to vector<2x8x1xf32>
    %21 = vector.broadcast %17 : vector<2x1x1xf32> to vector<2x8x1xf32>
    %22 = arith.mulf %20, %21 : vector<2x8x1xf32>
    %c0_12 = arith.constant 0 : index
    %c0_13 = arith.constant 0 : index
    %23 = vector.load %arg3[%c0_12, %c0_13] : memref<8x1xf32, #tpu.memory_space<vmem>>, vector<8x1xf32>
    %24 = vector.broadcast %6 : vector<2x1x1xf32> to vector<2x8x1xf32>
    %25 = arith.mulf %24, %22 : vector<2x8x1xf32>
    %26 = vector.shape_cast %23 : vector<8x1xf32> to vector<1x8x1xf32>
    %27 = vector.broadcast %26 : vector<1x8x1xf32> to vector<2x8x1xf32>
    %28 = arith.subf %27, %25 : vector<2x8x1xf32>
    %c0_14 = arith.constant 0 : index
    %c0_15 = arith.constant 0 : index
    %c0_16 = arith.constant 0 : index
    %29 = vector.load %arg1[%c0_14, %c0_15, %c0_16] : memref<2x8x128xf32, #tpu.memory_space<vmem>>, vector<2x8x128xf32>
    %30 = vector.broadcast %22 : vector<2x8x1xf32> to vector<2x8x128xf32>
    %31 = arith.mulf %29, %30 : vector<2x8x128xf32>
    %32 = vector.broadcast %28 : vector<2x8x1xf32> to vector<2x8x128xf32>
    %33 = arith.addf %31, %32 : vector<2x8x128xf32>
    %c0_17 = arith.constant 0 : index
    %c0_18 = arith.constant 0 : index
    %c0_19 = arith.constant 0 : index
    %34 = vector.load %arg4[%c0_17, %c0_18, %c0_19] : memref<2x8x128xf32, #tpu.memory_space<vmem>>, vector<2x8x128xf32>
    tpu.vector_store %arg4[%c0_17, %c0_18, %c0_19], %33 {strides = array<i32>} : memref<2x8x128xf32, #tpu.memory_space<vmem>>, vector<2x8x128xf32>,
    return
  }
  func.func @transform_0(%arg0: i32) -> (i32, i32, i32) {
    %c0_i32 = arith.constant 0 : i32
    %c0_i32_0 = arith.constant 0 : i32
    %c0_i32_1 = arith.constant 0 : i32
    return %arg0, %c0_i32, %c0_i32_0 : i32, i32, i32
  }
  func.func @transform_1(%arg0: i32) -> (i32, i32) {
    %c0_i32 = arith.constant 0 : i32
    %c0_i32_0 = arith.constant 0 : i32
    %c0_i32_1 = arith.constant 0 : i32
    return %c0_i32, %c0_i32_0 : i32, i32
  }
  func.func @transform_2(%arg0: i32) -> (i32, i32) {
    %c0_i32 = arith.constant 0 : i32
    %c0_i32_0 = arith.constant 0 : i32
    %c0_i32_1 = arith.constant 0 : i32
    return %c0_i32, %c0_i32_0 : i32, i32
  }
  func.func @transform_3(%arg0: i32) -> (i32, i32, i32) {
    %c0_i32 = arith.constant 0 : i32
    %c0_i32_0 = arith.constant 0 : i32
    %c0_i32_1 = arith.constant 0 : i32
    return %arg0, %c0_i32, %c0_i32_0 : i32, i32, i32
  }
}

</mosaic_0001>

<bundles_post_ra>
// kernel: tpu_custom_call.1
= control target key start
LH: loop header
LB: loop body
LE: loop exit
PB: predicated region body
PF: predicated region fallthrough
CT: control target
= control target key end

     0   :  { %s203_s0 = inlined_call_operand.vmem [shape: f32[2,8,128], index: 0, kind: input, shape index: {}]   ;;  %s204_s1 = inlined_call_operand.vmem [shape: f32[8,1], index: 1, kind: input, shape index: {}]   ;;  %s205_s2 = inlined_call_operand.vmem [shape: f32[8,1], index: 2, kind: input, shape index: {}]   ;;  %s206_s3 = inlined_call_operand.hbm [shape: f32[2,8,128], index: 3, kind: output, shape index: {}]  }
   0x1   :  { %v170_v0 = vld [vmem:[%s203_s0] sm:$0xff]  ;;  %v175_v1 = vld [vmem:[%s203_s0 + $0x8] sm:$0xff] }
   0x2   :  { %8 = vsyncpa [#allocation3], 0  ;;  %v17_v2 = vrot.slane %v170_v0, 4  ;;  %v23_v3 = vrot.slane %v175_v1, 4  ;;  %v143_v34 = vmov 0   ;;  %v59_v39 = vld [vmem:[%s204_s1] sm:$0xff] }
   0x3   :  { %113 = vset.pattern.permute.xlu0 %v143_v34  ;;  %114 = vset.pattern.permute.xlu1 %v143_v34  ;;  %v62_v45 = vld [vmem:[%s205_s2] sm:$0xff]  ;;  %s144_s1 = smov [#allocation2]  }
   0x4   :  { %v18_v4 = vadd.f32 %v17_v2, %v170_v0  ;;  %v24_v5 = vadd.f32 %v23_v3, %v175_v1  ;;  %s98_s19 = sshll.u32 %s144_s1, 4  ;;  %s99_s19 = int_to_ptr.vmem [resolvable:$true] %s98_s19 }
   0x5   :  { %s119_s2 = scalar_lea.vmem %s99_s19, 256  ;;  %p124_p1 = scmp.lt.s32.totalorder %s99_s19, %s99_s19 }
   0x6   :  { %v19_v6 = vrot.slane %v18_v4, 2  ;;  %v25_v7 = vrot.slane %v24_v5, 2  ;;  %p120_p0 = scmp.ne.s32.totalorder %s99_s19, %s119_s2  ;;  %p125_p2 = scmp.lt.s32.totalorder %s119_s2, %s119_s2 }
   0x8   :  { %v20_v8 = vadd.f32 %v19_v6, %v18_v4  ;;  %v26_v9 = vadd.f32 %v25_v7, %v24_v5  ;;  %p126_p3 = por %p125_p2, %p124_p1 }
   0xa   :  { %v21_v10 = vrot.slane %v20_v8, 1  ;;  %v27_v11 = vrot.slane %v26_v9, 1  ;;  %p127_p4 = pnand %p126_p3, %p120_p0 }
   0xc   :  { %v22_v12 = vadd.f32 %v21_v10, %v20_v8  ;;  %v28_v13 = vadd.f32 %v27_v11, %v26_v9 }
   0xe   :  { %29 = vadd.xlane.f32.xlu0 %v22_v12 }
  0x12   :  { %31 = vadd.xlane.f32.xlu0 %v28_v13 }
  0x9b   :  { %v30_v14 = vpop.xlane.xlu0 %29 }
  0x9c   :  { %v33_v15 = vmul.f32 0.0009765625, %v30_v14 }
  0x9e   :  { %v35_v16 = vsub.f32 %v170_v0, %v33_v15 }
  0x9f   :  { %v32_v17 = vpop.xlane.xlu0 %31 }
  0xa0   :  { %v37_v18 = vmul.f32 %v35_v16, %v35_v16  ;;  %v34_v19 = vmul.f32 0.0009765625, %v32_v17 }
  0xa2   :  { %v39_v20 = vrot.slane %v37_v18, 4  ;;  %v36_v21 = vsub.f32 %v175_v1, %v34_v19 }
  0xa4   :  { %v38_v22 = vmul.f32 %v36_v21, %v36_v21  ;;  %v40_v23 = vadd.f32 %v39_v20, %v37_v18 }
  0xa6   :  { %v45_v24 = vrot.slane %v38_v22, 4  ;;  %v41_v25 = vrot.slane %v40_v23, 2 }
  0xa8   :  { %v46_v26 = vadd.f32 %v45_v24, %v38_v22  ;;  %v42_v27 = vadd.f32 %v41_v25, %v40_v23 }
  0xaa   :  { %v43_v28 = vrot.slane %v42_v27, 1  ;;  %v47_v29 = vrot.slane %v46_v26, 2 }
  0xac   :  { %v44_v30 = vadd.f32 %v43_v28, %v42_v27  ;;  %v48_v31 = vadd.f32 %v47_v29, %v46_v26 }
  0xae   :  { %51 = vadd.xlane.f32.xlu1 %v44_v30  ;;  %v49_v32 = vrot.slane %v48_v31, 1 }
  0xb0   :  { %v50_v33 = vadd.f32 %v49_v32, %v48_v31 }
  0xb2   :  { %53 = vadd.xlane.f32.xlu1 %v50_v33 }
 0x13b   :  { %v52_v35 = vpop.xlane.xlu1 %51 }
 0x13c   :  { %v55_v36 = vmul.f32 0.0009775171, %v52_v35 }
 0x13e   :  { %115 = vrsqrt.f32 %v55_v36 }
 0x13f   :  { %v54_v37 = vpop.xlane.xlu1 %53 }
 0x140   :  { %v56_v38 = vmul.f32 0.0009775171, %v54_v37 }
 0x142   :  { %117 = vrsqrt.f32 %v56_v38 }
 0x148   :  { %v116_v40 = vpop.eup %115 }
 0x149   :  { %v60_v41 = vmul.f32 %v116_v40, %v59_v39 }
 0x14b   :  { %69 = vperm.xlu0 %113, %v60_v41   ;;  %v63_v44 = vmul.f32 %v60_v41, %v33_v15 }
 0x14c   :  { %v118_v42 = vpop.eup %117 }
 0x14d   :  { %v61_v43 = vmul.f32 %v118_v42, %v59_v39  ;;  %v65_v46 = vsub.f32 %v62_v45, %v63_v44 }
 0x14f   :  { %74 = vperm.xlu1 %114, %v61_v43   ;;  %v64_v47 = vmul.f32 %v61_v43, %v34_v19 }
 0x151   :  { %v66_v48 = vsub.f32 %v62_v45, %v64_v47 }
 0x153   :  { %81 = vperm.xlu1 %114, %v65_v46  }
 0x157   :  { %86 = vperm.xlu1 %114, %v66_v48  }
 0x1ca   :  { %v70_v49 = vpop.permute.xlu0 %69 }
 0x1cb   :  { %v77_v51 = vmul.f32 %v70_v49, %v170_v0 }
 0x1ce   :  { %v75_v50 = vpop.permute.xlu1 %74 }
 0x1cf   :  { %v78_v54 = vmul.f32 %v75_v50, %v175_v1 }
 0x1d2   :  { %v82_v52 = vpop.permute.xlu1 %81 }
 0x1d3   :  { %v89_v53 = vadd.f32 %v82_v52, %v77_v51 }
 0x1d5   :  { %91 = vst [vmem:[#allocation2] sm:$0xff] %v89_v53 }
 0x1d6   :  { %v87_v55 = vpop.permute.xlu1 %86 }
 0x1d7   :  { %v90_v56 = vadd.f32 %v87_v55, %v78_v54 }
 0x1d9   :  { %92 = vst [vmem:[#allocation2 + $0x8] sm:$0xff] %v90_v56 }
 0x1da   :  { %130 = shalt.err (!%p127_p4)
}
 0x1db   :  { %s131_s22 = scalar_lea.hbm %s206_s3, 256 }
 0x1dc   :  { %p132_p5 = scmp.ne.s32.totalorder %s206_s3, %s131_s22  ;;  %p135_p6 = scmp.lt.u32.totalorder %s131_s22, %s206_s3 }
 0x1de   :  { %p137_p7 = pnand %p135_p6, %p132_p5 }
 0x1e0   :  { %140 = shalt.err (!%p137_p7)
}
 0x1e1   :  { %s145_s27 = smov 128   ;;  %s146_s28 = smov 8  }
 0x1e2   :  { %104 = dma.vmem_to_hbm [thread:$0]  %s99_s19, 256, %s206_s3, [#allocation3], %s145_s27, %s145_s27, %s146_s28  }
 0x1e3   :  { %141 = dma.done.wait [#allocation3], 256  }
 0x1e4   :  { %142 = vsyncadd [#allocation3], 4294967040 }
 0x1e5   :  { %108 = vsyncpa [#allocation3], 1 }

</bundles_post_ra>
